<compile_context>
chip_gen: v5e
topology: v5e:2x2
jax: 0.10.0
libtpu: 0.0.40
codegen_flags: <defaults>
</compile_context>

<pallas_src>
import functools

import numpy as np
import jax
import jax.numpy as jnp
from jax import lax
from jax.experimental import pallas as pl
from jax.experimental.pallas import tpu as pltpu


# ----------------------------------------------------------------------------
# Generation-aware VMEM budgets
# ----------------------------------------------------------------------------
@functools.lru_cache(maxsize=1)
def _vmem_capacity_bytes():
    try:
        return int(pltpu.get_tpu_info().vmem_capacity_bytes)
    except Exception:
        return 64 << 20          # conservative (v7x-sized) default if query fails


def _kernel1_budgets():
    """Returns (tile budget, vmem_limit_bytes, prefer_2way_split)."""
    cap = _vmem_capacity_bytes()
    if cap <= (80 << 20):        # v7x-like: 64 MiB VMEM per TC, 2 TensorCores
        return 24 << 20, 32 << 20, True
    return 64 << 20, 96 << 20, False   # v5e / v6e: 128 MiB VMEM, single TC


# ----------------------------------------------------------------------------
# Tiling heuristics for kernel 1
# ----------------------------------------------------------------------------
def _choose_tiles(B, N, C, n_inputs, itemsize, budget_bytes, prefer_split):
    """Pick (batch_tile, token_tile) so double-buffered input tiles plus the
    in-kernel f32 temporaries fit in `budget_bytes`, with dims that keep the
    2-D (bt, nt) outputs legal: bt == B or bt % 8 == 0, nt == N or nt % 128 == 0."""
    per_token = C * (2 * n_inputs * itemsize + 4 * n_inputs + 8)
    max_tokens = max(1, budget_bytes // max(per_token, 1))

    if B * N <= max_tokens:
        bt, nt = B, N
        if prefer_split:                      # give the 2nd TensorCore work (v7x)
            if N % 256 == 0:
                nt = N // 2
            elif B % 16 == 0:
                bt = B // 2
        return int(bt), int(nt)

    if N <= max_tokens:
        b_fit = max_tokens // N
        if b_fit >= 8:                        # sublane-aligned batch tile
            return int(min(B, (b_fit // 8) * 8)), int(N)

    # Token-axis tiling: batch tile is full-B (if small) or 8; token tile is a
    # multiple of 128 (or full N).
    bt = B if B <= 8 else 8
    nt = (max_tokens // bt // 128) * 128
    nt = int(min(N, max(128, nt)))
    # TODO(synk): extremely large C on small-VMEM parts can still exceed the
    # budget at the minimum legal (bt, 128) tile; that would need a C-tiled
    # two-pass reduction which is not implemented here.
    return int(bt), nt


# ----------------------------------------------------------------------------
# Kernel 1: token importance + threshold mask (lane-dense (B, N) outputs)
# ----------------------------------------------------------------------------
def _make_importance_kernel(method):
    def compute(thr_ref, x_ref, prev_ref, imp_ref, mask_ref):
        C = x_ref.shape[-1]
        if method == "delta":
            # Subtract in the input dtype; widen to f32 only inside the square
            # (avoids two full f32 copies of bf16 inputs).  Exact for f32 input.
            d = (x_ref[...] - prev_ref[...]).astype(jnp.float32)
            imp = jnp.sqrt(jnp.sum(d * d, axis=-1))
        elif method == "l2":
            xf = x_ref[...].astype(jnp.float32)
            imp = jnp.sqrt(jnp.sum(xf * xf, axis=-1))
        elif method == "mean":
            imp = jnp.mean(x_ref[...].astype(jnp.float32), axis=-1)
        elif method == "var":
            xf = x_ref[...].astype(jnp.float32)
            mu = jnp.mean(xf, axis=-1, keepdims=True)
            imp = jnp.sum((xf - mu) ** 2, axis=-1) / (C - 1)   # unbiased (torch.var)
        else:
            raise ValueError(f"unsupported method in kernel: {method}")
        thr = thr_ref[0]                                       # scalar from SMEM
        imp_ref[...] = imp
        mask_ref[...] = (imp >= thr).astype(jnp.float32)

    if method == "delta":
        return compute

    def no_prev(thr_ref, x_ref, imp_ref, mask_ref):
        compute(thr_ref, x_ref, None, imp_ref, mask_ref)

    return no_prev


def importance_and_mask(x, prev_x, threshold, method):
    """Lane-dense (B, N) importance scores and (pre-fallback) keep mask."""
    B, N, C = x.shape
    n_inputs = 2 if method == "delta" else 1
    budget, vmem_limit, prefer_split = _kernel1_budgets()
    bt, nt = _choose_tiles(B, N, C, n_inputs, x.dtype.itemsize, budget, prefer_split)
    grid = (pl.cdiv(B, bt), pl.cdiv(N, nt))

    thr_arr = jnp.asarray(threshold, dtype=jnp.float32).reshape(1)

    tile_spec = pl.BlockSpec((bt, nt, C), lambda ib, it: (ib, it, 0))
    in_specs = [pl.BlockSpec(memory_space=pltpu.MemorySpace.SMEM), tile_spec]
    args = [thr_arr, x]
    if method == "delta":
        in_specs.append(tile_spec)
        args.append(prev_x)
    out_spec = pl.BlockSpec((bt, nt), lambda ib, it: (ib, it))

    imp, mask = pl.pallas_call(
        _make_importance_kernel(method),
        out_shape=(
            jax.ShapeDtypeStruct((B, N), jnp.float32),
            jax.ShapeDtypeStruct((B, N), jnp.float32),
        ),
        grid=grid,
        in_specs=in_specs,
        out_specs=(out_spec, out_spec),
        compiler_params=pltpu.CompilerParams(
            dimension_semantics=("parallel", "parallel"),
            vmem_limit_bytes=vmem_limit,
        ),
    )(*args)
    return imp, mask


# ----------------------------------------------------------------------------
# Kernel 2: tile-per-step DMA gather of kept tokens.
#   - x stays in HBM (pl.ANY); idx table + keep counts are scalar-prefetched.
#   - Only kept rows are DMA'd (padded slots never touch HBM); output store is
#     one dense (TM, C) block per grid step.
# ----------------------------------------------------------------------------
def _gather_kernel(idx_ref, cnt_ref, x_hbm, out_ref, buf, sem):
    b = pl.program_id(0)
    mt = pl.program_id(1)
    tm, _ = buf.shape
    base = mt * tm
    n_valid = jnp.clip(cnt_ref[b] - base, 0, tm)        # kept rows in this tile

    def issue(t, carry):
        idx = idx_ref[b, base + t]                       # token id of kept slot t
        pltpu.make_async_copy(
            x_hbm.at[b, pl.ds(idx, 1), :], buf.at[pl.ds(t, 1), :], sem
        ).start()
        return carry

    lax.fori_loop(0, n_valid, issue, jnp.int32(0))

    def wait(_, carry):
        # All row copies have identical shapes, so waiting n_valid times with a
        # same-shaped descriptor consumes exactly the signals of the issued DMAs.
        pltpu.make_async_copy(
            x_hbm.at[b, pl.ds(0, 1), :], buf.at[pl.ds(0, 1), :], sem
        ).wait()
        return carry

    lax.fori_loop(0, n_valid, wait, jnp.int32(0))

    row = lax.broadcasted_iota(jnp.int32, (tm, 1), 0)
    keep = row < n_valid                                 # padded slots -> zeros
    out_ref[...] = jnp.where(keep, buf[...], jnp.zeros_like(buf)).reshape(out_ref.shape)


def gather_tokens(x, idx_padded, counts, tm):
    """out[b, m] = x[b, idx_padded[b, m]] for m < counts[b], zeros otherwise.
    idx_padded must be compacted (kept token ids first, -1 padding after)."""
    B, N, C = x.shape
    m_pad = idx_padded.shape[1]
    assert m_pad % tm == 0

    grid_spec = pltpu.PrefetchScalarGridSpec(
        num_scalar_prefetch=2,                           # idx table + counts -> SMEM
        grid=(B, m_pad // tm),
        in_specs=[pl.BlockSpec(memory_space=pl.ANY)],    # x stays in HBM
        out_specs=pl.BlockSpec((1, tm, C), lambda b, mt, idx, cnt: (b, mt, 0)),
        scratch_shapes=[
            pltpu.VMEM((tm, C), x.dtype),
            pltpu.SemaphoreType.DMA,
        ],
    )
    return pl.pallas_call(
        _gather_kernel,
        out_shape=jax.ShapeDtypeStruct((B, m_pad, C), x.dtype),
        grid_spec=grid_spec,
        compiler_params=pltpu.CompilerParams(
            dimension_semantics=("parallel", "arbitrary"),
        ),
    )(idx_padded.astype(jnp.int32), counts.astype(jnp.int32), x)


# ----------------------------------------------------------------------------
# Jitted wrapper glue
# ----------------------------------------------------------------------------
@functools.partial(jax.jit, static_argnames=("method",))
def _analyze(x, prev_x, thr_base, thr_param, method):
    threshold = jnp.maximum(thr_base + thr_param, 0.0)
    imp, mask = importance_and_mask(x, prev_x, threshold, method)
    # Top-1 fallback for rows that kept nothing (NaN-safe: an all-NaN row picks
    # token 0, whereas torch.topk would pick a NaN entry — documented edge case).
    N = imp.shape[1]
    imp_safe = jnp.where(jnp.isnan(imp), -jnp.inf, imp)
    top1 = jax.nn.one_hot(jnp.argmax(imp_safe, axis=1), N, dtype=mask.dtype)
    kept_any = jnp.sum(mask, axis=1, keepdims=True) >= 1.0
    mask = jnp.where(kept_any, mask, top1)
    counts = jnp.sum(mask, axis=1).astype(jnp.int32)
    return threshold, imp, mask, counts


@functools.partial(jax.jit, static_argnames=("max_keep", "tm"))
def _compact(x, mask, counts, max_keep, tm):
    B, N, _ = x.shape
    m_pad = ((max_keep + tm - 1) // tm) * tm
    kept = mask > 0.0
    # O(N) cumsum compaction: kept token n lands in slot cumsum-1; pruned tokens
    # are dumped into an overflow column that is sliced away.
    pos = jnp.cumsum(kept.astype(jnp.int32), axis=1) - 1
    dest = jnp.where(kept, pos, m_pad)
    token_ids = jnp.broadcast_to(jnp.arange(N, dtype=jnp.int32)[None, :], (B, N))
    idx_full = jnp.full((B, m_pad + 1), -1, dtype=jnp.int32)
    idx_full = idx_full.at[jnp.arange(B)[:, None], dest].set(token_ids)
    idx_padded = idx_full[:, :m_pad]

    out = gather_tokens(x, idx_padded, counts, tm)       # (B, m_pad, C)
    return out[:, :max_keep], idx_padded


# ----------------------------------------------------------------------------
# Module wrapper (mirrors the PyTorch module's forward semantics)
# ----------------------------------------------------------------------------
class MambaAbsoluteThresholdPrunerPallas:
    def __init__(self, layer_idx, total_layers, final_token_threshold, method="delta"):
        self.keep_threshold_base = jnp.float32(
            final_token_threshold * layer_idx / total_layers
        )
        self.keep_threshold = jnp.float32(0.0)   # learnable param, init to zero
        self.method = method

    def __call__(self, x, prev_x=None, B_mat=None, C_mat=None):
        B, N, C = x.shape
        if self.method == "abc":
            # TODO(synk): 'abc' importance (B_mat/C_mat flatten + norm) not implemented.
            raise NotImplementedError("'abc' method not implemented in Pallas port")
        if self.method not in ("l2", "mean", "var", "delta"):
            raise ValueError(f"Unknown importance method: {self.method}")
        if self.method == "delta" and prev_x is None:
            raise ValueError("prev_x is required for 'delta' method")
        if self.method == "var" and C < 2:
            raise ValueError("'var' requires C >= 2 (unbiased variance of one element is undefined)")

        threshold, imp, mask, counts = _analyze(
            x,
            prev_x if self.method == "delta" else None,
            self.keep_threshold_base,
            self.keep_threshold,
            self.method,
        )

        # Single host sync to learn the dynamic output width (torch's .item()).
        counts_host = np.asarray(jax.device_get(counts))
        max_keep = int(counts_host.max())

        tm = max_keep if max_keep <= 128 else 128
        out, idx_padded = _compact(x, mask, counts, max_keep=max_keep, tm=tm)

        # One bulk copy of the index table; per-batch lists are host-side slices.
        idx_host = np.asarray(jax.device_get(idx_padded))
        indices = [idx_host[b, : int(counts_host[b])] for b in range(B)]

        info = {
            "threshold": threshold,
            "importance": imp,
            "mask": mask,
            "indices": indices,
        }
        return out, info


if __name__ == "__main__":
    key = jax.random.PRNGKey(0)
    k1, k2 = jax.random.split(key)
    B, N, C = 2, 8, 32
    x = jax.random.normal(k1, (B, N, C), dtype=jnp.float32)
    prev_x = jax.random.normal(k2, (B, N, C), dtype=jnp.float32)

    # threshold = 16.0 * 2 / 4 = 8.0  (~E[||x - prev||] = sqrt(2C) for N(0,1) data)
    pruner = MambaAbsoluteThresholdPrunerPallas(
        layer_idx=2, total_layers=4, final_token_threshold=16.0, method="delta"
    )
    out, info = pruner(x, prev_x)
    jax.block_until_ready(out)
    jax.block_until_ready(info["importance"])
    jax.block_until_ready(info["mask"])

    # Lightweight reference check of the forward semantics.
    xn, pn = np.asarray(x), np.asarray(prev_x)
    imp_np = np.sqrt(((xn - pn) ** 2).sum(-1))
    imp_k = np.asarray(info["importance"])
    assert np.allclose(imp_k, imp_np, atol=1e-4, rtol=1e-4)

    thr_ref = max(16.0 * 2 / 4, 0.0)
    mask_ref = (imp_k >= thr_ref).astype(np.float32)
    for b in range(B):
        if mask_ref[b].sum() < 1:
            mask_ref[b, imp_k[b].argmax()] = 1.0
    assert np.array_equal(np.asarray(info["mask"]), mask_ref)

    max_keep = int(mask_ref.sum(1).max())
    out_ref = np.zeros((B, max_keep, C), dtype=np.float32)
    for b in range(B):
        idx_b = np.nonzero(mask_ref[b])[0]
        out_ref[b, : idx_b.size] = xn[b, idx_b]
        assert np.array_equal(np.asarray(info["indices"][b]).astype(np.int64), idx_b)
    assert out.shape == out_ref.shape
    assert np.allclose(np.asarray(out), out_ref, atol=1e-5, rtol=1e-5)

    print("KERNEL_OK")
</pallas_src>

<mosaic_0001>
module attributes {stable_mosaic.version = 11 : i64} {
  func.func @compute(%arg0: i32, %arg1: i32, %arg2: memref<1xf32, #tpu.memory_space<smem>>, %arg3: memref<2x8x32xf32, #tpu.memory_space<vmem>>, %arg4: memref<2x8x32xf32, #tpu.memory_space<vmem>>, %arg5: memref<2x8xf32, #tpu.memory_space<vmem>>, %arg6: memref<2x8xf32, #tpu.memory_space<vmem>>) attributes {dimension_semantics = [#tpu.dimension_semantics<parallel>, #tpu.dimension_semantics<parallel>], iteration_bounds = array<i64: 1, 1>, scalar_prefetch = 0 : i64, scratch_operands = 0 : i64, tpu.core_type = #tpu.core_type<tc>, window_params = [{transform_indices = @transform_0, window_bounds = array<i64: 1>}, {transform_indices = @transform_1, window_bounds = array<i64: 2, 8, 32>}, {transform_indices = @transform_2, window_bounds = array<i64: 2, 8, 32>}, {transform_indices = @transform_3, window_bounds = array<i64: 2, 8>}, {transform_indices = @transform_4, window_bounds = array<i64: 2, 8>}]} {
    %c0 = arith.constant 0 : index
    %c0_0 = arith.constant 0 : index
    %c0_1 = arith.constant 0 : index
    %0 = vector.load %arg3[%c0, %c0_0, %c0_1] : memref<2x8x32xf32, #tpu.memory_space<vmem>>, vector<2x8x32xf32>
    %c0_2 = arith.constant 0 : index
    %c0_3 = arith.constant 0 : index
    %c0_4 = arith.constant 0 : index
    %1 = vector.load %arg4[%c0_2, %c0_3, %c0_4] : memref<2x8x32xf32, #tpu.memory_space<vmem>>, vector<2x8x32xf32>
    %2 = arith.subf %0, %1 : vector<2x8x32xf32>
    %3 = arith.mulf %2, %2 : vector<2x8x32xf32>
    %cst = arith.constant dense<0.000000e+00> : vector<2x8xf32>
    %4 = vector.multi_reduction <add>, %3, %cst [2] : vector<2x8x32xf32> to vector<2x8xf32>
    %5 = math.sqrt %4 : vector<2x8xf32>
    %c0_5 = arith.constant 0 : index
    %6 = memref.load %arg2[%c0_5] : memref<1xf32, #tpu.memory_space<smem>>
    %c0_6 = arith.constant 0 : index
    %c0_7 = arith.constant 0 : index
    %7 = vector.load %arg5[%c0_6, %c0_7] : memref<2x8xf32, #tpu.memory_space<vmem>>, vector<2x8xf32>
    tpu.vector_store %arg5[%c0_6, %c0_7], %5 {strides = array<i32>} : memref<2x8xf32, #tpu.memory_space<vmem>>, vector<2x8xf32>,
    %8 = vector.broadcast %6 : f32 to vector<2x8xf32>
    %9 = arith.cmpf oge, %5, %8 : vector<2x8xf32>
    %10 = arith.extui %9 : vector<2x8xi1> to vector<2x8xi32>
    %11 = arith.sitofp %10 : vector<2x8xi32> to vector<2x8xf32>
    %c0_8 = arith.constant 0 : index
    %c0_9 = arith.constant 0 : index
    %12 = vector.load %arg6[%c0_8, %c0_9] : memref<2x8xf32, #tpu.memory_space<vmem>>, vector<2x8xf32>
    tpu.vector_store %arg6[%c0_8, %c0_9], %11 {strides = array<i32>} : memref<2x8xf32, #tpu.memory_space<vmem>>, vector<2x8xf32>,
    return
  }
  func.func @transform_0(%arg0: i32, %arg1: i32) -> i32 {
    %c0_i32 = arith.constant 0 : i32
    %c0_i32_0 = arith.constant 0 : i32
    return %c0_i32 : i32
  }
  func.func @transform_1(%arg0: i32, %arg1: i32) -> (i32, i32, i32) {
    %c0_i32 = arith.constant 0 : i32
    %c0_i32_0 = arith.constant 0 : i32
    return %arg0, %arg1, %c0_i32 : i32, i32, i32
  }
  func.func @transform_2(%arg0: i32, %arg1: i32) -> (i32, i32, i32) {
    %c0_i32 = arith.constant 0 : i32
    %c0_i32_0 = arith.constant 0 : i32
    return %arg0, %arg1, %c0_i32 : i32, i32, i32
  }
  func.func @transform_3(%arg0: i32, %arg1: i32) -> (i32, i32) {
    %c0_i32 = arith.constant 0 : i32
    return %arg0, %arg1 : i32, i32
  }
  func.func @transform_4(%arg0: i32, %arg1: i32) -> (i32, i32) {
    %c0_i32 = arith.constant 0 : i32
    return %arg0, %arg1 : i32, i32
  }
}

</mosaic_0001>

<bundles_post_ra>
// kernel: _analyze.1
= control target key start
LH: loop header
LB: loop body
LE: loop exit
PB: predicated region body
PF: predicated region fallthrough
CT: control target
= control target key end

     0   :  { %11 = vsyncpa [#allocation4], 0  ;;  %s232_s0 = inlined_call_operand.<no memory space> [shape: f32[1], index: 0, kind: input, shape index: {}]   ;;  %s233_s1 = inlined_call_operand.hbm [shape: f32[2,8,32], index: 1, kind: input, shape index: {}]   ;;  %s234_s2 = inlined_call_operand.hbm [shape: f32[2,8,32], index: 2, kind: input, shape index: {}]   ;;  %s235_s3 = inlined_call_operand.vmem [shape: f32[2,8], index: 3, kind: output, shape index: {0}]   ;;  %s236_s4 = inlined_call_operand.vmem [shape: f32[2,8], index: 4, kind: output, shape index: {1}]  }
   0x1   :  { %s19_s17 = sshll.u32 %s233_s1, 4  ;;  %s20_s17 = int_to_ptr.hbm [resolvable:$true] %s19_s17 }
   0x2   :  { %12 = vsyncpa [#allocation6], 0  ;;  %s187_s18 = smov [#allocation3]   ;;  %s32_s22 = sshll.u32 %s234_s2, 4  ;;  %s33_s22 = int_to_ptr.hbm [resolvable:$true] %s32_s22 }
   0x3   :  { %s21_s19 = sshll.u32 %s187_s18, 4  ;;  %s188_s23 = smov 128   ;;  %s22_s19 = int_to_ptr.vmem [resolvable:$true] %s21_s19 }
   0x4   :  { %s189_s24 = smov 8   ;;  %s190_s25 = smov [#allocation5]  }
   0x5   :  { %27 = dma.hbm_to_vmem [thread:$0]  %s20_s17, 256, %s22_s19, [#allocation4], %s188_s23, %s188_s23, %s189_s24  }
   0x6   :  { %s34_s26 = sshll.u32 %s190_s25, 4  ;;  %s35_s26 = int_to_ptr.vmem [resolvable:$true] %s34_s26 }
   0x7   :  { %40 = dma.hbm_to_vmem [thread:$0]  %s33_s22, 256, %s35_s26, [#allocation6], %s188_s23, %s188_s23, %s189_s24  }
   0x8   :  { %183 = dma.done.wait [#allocation4], 256  }
   0x9   :  { %184 = vsyncadd [#allocation4], 4294967040 }
   0xa   :  { %185 = dma.done.wait [#allocation6], 256  }
   0xb   :  { %186 = vsyncadd [#allocation6], 4294967040  ;;  %v49_v0 = vld [vmem:[#allocation3] sm:$0xff]  ;;  %v51_v1 = vld [vmem:[#allocation5] sm:$0xff]  ;;  %vm57_vm0 = vcmask 261120   ;;  %v91_v25 = vlaneseq  ;;  %v100_v28 = vstv %s232_s0  ;;  %vm95_vm6 = vcmask 1041409  }
   0xc   :  { %v50_v2 = vld [vmem:[#allocation3 + $0x8] sm:$0xff]  ;;  %v53_v3 = vsub.f32 %v49_v0, %v51_v1  ;;  %v52_v4 = vld [vmem:[#allocation5 + $0x8] sm:$0xff]  ;;  %v191_v34 = vmov 0.0   ;;  %vm98_vm7 = vcmask 58368  }
   0xd   :  { %v54_v6 = vsub.f32 %v50_v2, %v52_v4  ;;  %v92_v30 = vand.u32 127, %v91_v25 }
   0xe   :  { %v55_v5 = vmul.f32 %v53_v3, %v53_v3 }
   0xf   :  { %v56_v8 = vmul.f32 %v54_v6, %v54_v6 }
  0x10   :  { %v58_v7 = vsel %vm57_vm0, %v55_v5, 0.0 }
  0x11   :  { %59 = vadd.xlane.f32.xlu0 %v58_v7  ;;  %v61_v9 = vsel %vm57_vm0, %v56_v8, 0.0 }
  0x19   :  { %62 = vadd.xlane.f32.xlu0 %v61_v9 }
  0x84   :  { %v60_v10 = vpop.xlane.xlu0 %59 }
  0x85   :  { %131 = vrsqrt.f32 %v60_v10  ;;  %vm71_vm1 = vcmp.eq.f32.partialorder %v60_v10, inf  ;;  %v74_v24 = vand.u32 2147483648, %v60_v10  ;;  %vm73_vm2 = vcmp.eq.f32.partialorder %v60_v10, 0.0 }
  0x8b   :  { %v132_v11 = vpop.eup %131 }
  0x8c   :  { %v65_v12 = vmul.f32 %v132_v11, %v60_v10  ;;  %v63_v13 = vpop.xlane.xlu0 %62 }
  0x8d   :  { %133 = vrsqrt.f32 %v63_v13  ;;  %vm83_vm4 = vcmp.eq.f32.partialorder %v63_v13, inf  ;;  %v86_v32 = vand.u32 2147483648, %v63_v13  ;;  %vm85_vm5 = vcmp.eq.f32.partialorder %v63_v13, 0.0 }
  0x8e   :  { %v66_v14 = vmul.f32 %v132_v11, %v65_v12 }
  0x90   :  { %v67_v15 = vmul.f32 0.5, %v66_v14 }
  0x92   :  { %v68_v16 = vsub.f32 1.5, %v67_v15 }
  0x93   :  { %v134_v17 = vpop.eup %133 }
  0x94   :  { %v69_v18 = vmul.f32 %v132_v11, %v68_v16  ;;  %v77_v19 = vmul.f32 %v134_v17, %v63_v13 }
  0x96   :  { %v70_v20 = vmul.f32 %v69_v18, %v60_v10  ;;  %v78_v21 = vmul.f32 %v134_v17, %v77_v19 }
  0x98   :  { %v72_v22 = vsel %vm71_vm1, %v60_v10, %v70_v20  ;;  %v79_v23 = vmul.f32 0.5, %v78_v21 }
  0x99   :  { %v75_v27 = vsel %vm73_vm2, %v74_v24, %v72_v22 }
  0x9a   :  { %v80_v26 = vsub.f32 1.5, %v79_v23  ;;  %vm101_vm3 = vcmp.ge.f32.partialorder %v75_v27, %v100_v28  ;;  %v93_v37 = vperm.slane %v75_v27, %v92_v30 }
  0x9b   :  { %v124_v35 = vsel %vm101_vm3, 1.0, %v191_v34 }
  0x9c   :  { %v81_v29 = vmul.f32 %v134_v17, %v80_v26  ;;  %v109_v40 = vperm.slane %v124_v35, %v92_v30 }
  0x9e   :  { %v82_v31 = vmul.f32 %v81_v29, %v63_v13 }
  0xa0   :  { %v84_v33 = vsel %vm83_vm4, %v63_v13, %v82_v31 }
  0xa1   :  { %v87_v36 = vsel %vm85_vm5, %v86_v32, %v84_v33 }
  0xa2   :  { %v94_v38 = vperm.slane %v87_v36, %v92_v30  ;;  %vm102_vm8 = vcmp.ge.f32.partialorder %v87_v36, %v100_v28 }
  0xa3   :  { %v125_v39 = vsel %vm102_vm8, 1.0, %v191_v34 }
  0xa4   :  { %v96_v41 = vsel %vm95_vm6, %v94_v38, %v93_v37  ;;  %v110_v42 = vperm.slane %v125_v39, %v92_v30 }
  0xa5   :  { %99 = vst.msk [vmem:[%s235_s3] sm:$0x3] %vm98_vm7, %v96_v41 }
  0xa6   :  { %v111_v43 = vsel %vm95_vm6, %v110_v42, %v109_v40 }
  0xa7   :  { %113 = vst.msk [vmem:[%s236_s4] sm:$0x3] %vm98_vm7, %v111_v43 }
  0xa8   :  { %122 = vsyncpa [#allocation4], 1 }
  0xa9   :  { %123 = vsyncpa [#allocation6], 1 }

</bundles_post_ra>
